<compile_context>
chip_gen: v7x
topology: tpu7x:2x2x1
jax: 0.10.0
libtpu: 0.0.40
codegen_flags: <defaults>
</compile_context>

<pallas_src>
import jax
import jax.numpy as jnp
from jax import lax
from jax.experimental import pallas as pl
from jax.experimental.pallas import tpu as pltpu


def _make_row_sum_kernel(*, steps, tn, d, n_rows, masked):
    """Build the per-tile kernel.

    n_rows: true row count when tail masking is needed, else None (every row
            of every tile is a real row).
    """
    nb = tn // 8          # (8, d) slabs per tile
    pairs = nb // 2

    def kernel(*refs):
        if masked:
            seq_ref, msk_ref, out_ref = refs
        else:
            seq_ref, out_ref = refs
            msk_ref = None

        s = pl.program_id(0)
        i = pl.program_id(1)

        @pl.when(i == 0)
        def _():
            out_ref[...] = jnp.zeros_like(out_ref)

        # True (unclamped) first-row index of this tile; only needed for the
        # ragged-tail select.
        tile_base = (s * steps + i) * tn if n_rows is not None else None

        def slab(r):
            if not isinstance(r, int):
                r = pl.multiple_of(r, 8)
            x = seq_ref[pl.ds(r, 8), :].astype(jnp.float32)          # (8, d)
            if masked:
                # (8, 1) mask slab, lane-broadcast multiply.
                x = x * msk_ref[pl.ds(r, 8), :].astype(jnp.float32)
            if n_rows is not None:
                rows = tile_base + r + lax.broadcasted_iota(jnp.int32, (8, 1), 0)
                # select (not mul): garbage/NaN rows past N contribute exactly 0
                x = jnp.where(rows < n_rows, x, 0.0)
            return x

        zero = jnp.zeros((8, d), jnp.float32)

        def body(j, carry):
            a0, a1 = carry
            r0 = pl.multiple_of(j * 16, 16)
            return a0 + slab(r0), a1 + slab(r0 + 8)

        if pairs > 0:
            a0, a1 = lax.fori_loop(0, pairs, body, (zero, zero),
                                   unroll=4 if pairs >= 4 else True)
        else:
            a0, a1 = zero, zero
        if nb % 2:
            a0 = a0 + slab((nb - 1) * 8)

        out_ref[...] += a0 + a1

    return kernel


def avg_readout(seq, msk=None, *, tn=None, shards=1,
                tile_bytes=8 * 1024 * 1024, seq_buffers=2):
    """Pallas equivalent of AvgReadout.forward(seq, msk).

    seq: (N, D) array.  msk: optional (N,) weights.  Returns (D,) in seq.dtype.

    shards:      1 on single-TensorCore chips (v5e/v6e).  On v7x pass 2 so the
                 leading grid axis uses CORE_PARALLEL and the two TensorCores
                 stream disjoint halves of seq.
    tile_bytes:  per-buffer row-tile budget.  8 MiB is v7x-safe; 8-16 MiB is
                 fine on v5e/v6e (128 MiB physical VMEM).
    seq_buffers: pipeline depth for the seq stream (try 3 on v7x).
    NOTE: sum(msk) == 0 yields inf/nan, matching the torch reference.
    """
    N, D = seq.shape
    out_dtype = seq.dtype
    itemsize = seq.dtype.itemsize
    masked = msk is not None
    shards = max(1, int(shards))
    seq_buffers = max(2, int(seq_buffers))

    # Divisor from the TRUE inputs (hoisted O(N) scalar work, done by XLA).
    if masked:
        msk_f = msk.astype(jnp.float32).reshape(N, 1)
        inv = 1.0 / jnp.sum(msk_f)
    else:
        msk_f = None
        inv = jnp.float32(1.0 / N)

    # Corner case: fewer than 8 rows -> pad to one sublane group (tiny copy;
    # padded rows are exact zeros / zero mask, so they contribute nothing).
    seq_w, msk_w, n_work = seq, msk_f, N
    if N < 8:
        seq_w = jnp.pad(seq, ((0, 8 - N), (0, 0)))
        if masked:
            msk_w = jnp.pad(msk_f, ((0, 8 - N), (0, 0)))
        n_work = 8

    # --- Row-tile sizing: pure bytes budget (a (tn,1) mask block lane-pads
    # to 128 lanes in VMEM, so charge 512 B/row for it). -----------------------
    if tn is None:
        per_row = D * itemsize + (128 * 4 if masked else 0)
        tn = tile_bytes // max(1, per_row)
    tn = max(8, (int(tn) // 8) * 8)
    tn = min(tn, (n_work // 8) * 8)        # first block always starts in-range

    steps_total = pl.cdiv(n_work, tn)          # number of real row tiles
    steps = pl.cdiv(steps_total, shards)       # sequential steps per shard
    coverage = shards * steps * tn
    need_tail_mask = coverage != n_work
    last_blk = steps_total - 1

    # Clamp so trailing/duplicated tiles never DMA past the array; their rows
    # are zeroed by the in-kernel select.
    def row_map(s, i):
        return (jnp.minimum(s * steps + i, last_blk), 0)

    seq_kwargs = {}
    if seq_buffers != 2:
        seq_kwargs["pipeline_mode"] = pl.Buffered(seq_buffers)
    in_specs = [pl.BlockSpec((tn, D), row_map, **seq_kwargs)]
    args = [seq_w]
    if masked:
        in_specs.append(pl.BlockSpec((tn, 1), row_map))
        args.append(msk_w)

    out_spec = pl.BlockSpec((8, D), lambda s, i: (s, 0))
    out_shape = jax.ShapeDtypeStruct((shards * 8, D), jnp.float32)

    # VMEM budget: pipelined seq buffers + double-buffered mask tiles + output.
    vmem_bytes = (seq_buffers * tn * D * itemsize
                  + (2 * tn * 128 * 4 if masked else 0)
                  + 2 * shards * 8 * D * 4
                  + (4 << 20))
    vmem_bytes = int(min(max(vmem_bytes, 32 << 20), 128 << 20))

    cparams = pltpu.CompilerParams(
        dimension_semantics=(
            pltpu.CORE_PARALLEL if shards > 1 else pltpu.ARBITRARY,
            pltpu.ARBITRARY),
        vmem_limit_bytes=vmem_bytes,
    )
    cost = pl.CostEstimate(
        flops=(2 if masked else 1) * N * D,
        transcendentals=0,
        bytes_accessed=N * D * itemsize + (N * 4 if masked else 0)
                       + shards * 8 * D * 4,
    )

    kernel = _make_row_sum_kernel(
        steps=steps, tn=tn, d=D,
        n_rows=n_work if need_tail_mask else None, masked=masked)

    partial = pl.pallas_call(
        kernel,
        out_shape=out_shape,
        grid_spec=pltpu.PrefetchScalarGridSpec(
            num_scalar_prefetch=0,
            grid=(shards, steps),
            in_specs=in_specs,
            out_specs=out_spec,
        ),
        compiler_params=cparams,
        cost_estimate=cost,
    )(*args)

    # Collapse the tiny (shards*8, D) partial sums and apply the hoisted divisor.
    return (jnp.sum(partial, axis=0) * inv).astype(out_dtype)


if __name__ == "__main__":
    key = jax.random.PRNGKey(0)
    k_seq, k_msk = jax.random.split(key)

    N, D = 64, 128  # small shapes: 64 nodes, 128 features
    seq = jax.random.normal(k_seq, (N, D), dtype=jnp.float32)
    msk = (jax.random.uniform(k_msk, (N,)) > 0.5).astype(jnp.float32)

    # Case 1: msk is None -> plain mean over axis 0.
    out_none = avg_readout(seq, None)
    jax.block_until_ready(out_none)
    ref_none = jnp.mean(seq, axis=0)

    # Case 2: masked weighted mean.
    out_msk = avg_readout(seq, msk)
    ref_msk = jnp.sum(seq * msk[:, None], axis=0) / jnp.sum(msk)

    assert out_none.shape == (D,) and out_msk.shape == (D,)
    assert jnp.allclose(out_none, ref_none, atol=1e-5, rtol=1e-5)
    assert jnp.allclose(out_msk, ref_msk, atol=1e-5, rtol=1e-5)

    # Case 3: ragged N (in-kernel tail masking, no wrapper pad), both variants.
    Nr = 50
    seq_r, msk_r = seq[:Nr], msk[:Nr]
    out_r_none = avg_readout(seq_r, None)
    out_r_msk = avg_readout(seq_r, msk_r)
    ref_r_none = jnp.mean(seq_r, axis=0)
    ref_r_msk = jnp.sum(seq_r * msk_r[:, None], axis=0) / jnp.sum(msk_r)
    assert jnp.allclose(out_r_none, ref_r_none, atol=1e-5, rtol=1e-5)
    assert jnp.allclose(out_r_msk, ref_r_msk, atol=1e-5, rtol=1e-5)

    # Case 4: multi-step grid (forced small tn) with a partial last tile.
    N2, D2 = 300, 256
    seq2 = jax.random.normal(k_seq, (N2, D2), dtype=jnp.float32)
    msk2 = (jax.random.uniform(k_msk, (N2,)) > 0.3).astype(jnp.float32)
    out2 = avg_readout(seq2, msk2, tn=64)
    ref2 = jnp.sum(seq2 * msk2[:, None], axis=0) / jnp.sum(msk2)
    assert jnp.allclose(out2, ref2, atol=1e-4, rtol=1e-4)

    # Case 5: bf16 input exercises the bounded per-slab f32 upcast path.
    seq_bf = seq.astype(jnp.bfloat16)
    out_bf = avg_readout(seq_bf, msk)
    ref_bf = (jnp.sum(seq_bf.astype(jnp.float32) * msk[:, None], axis=0)
              / jnp.sum(msk))
    assert out_bf.dtype == jnp.bfloat16
    assert jnp.allclose(out_bf.astype(jnp.float32), ref_bf, atol=3e-2, rtol=3e-2)

    jax.block_until_ready(out_bf)
    print("KERNEL_OK")
</pallas_src>

<mosaic_0001>
module attributes {stable_mosaic.version = 11 : i64} {
  func.func @kernel(%arg0: i32, %arg1: i32, %arg2: memref<64x128xf32, #tpu.memory_space<vmem>>, %arg3: memref<8x128xf32, #tpu.memory_space<vmem>>) attributes {dimension_semantics = [#tpu.dimension_semantics<arbitrary>, #tpu.dimension_semantics<arbitrary>], iteration_bounds = array<i64: 1, 1>, scalar_prefetch = 0 : i64, scratch_operands = 0 : i64, tpu.core_type = #tpu.core_type<tc>, window_params = [{transform_indices = @transform_0, window_bounds = array<i64: 64, 128>}, {transform_indices = @transform_1, window_bounds = array<i64: 8, 128>}]} {
    %c0_i32 = arith.constant 0 : i32
    %0 = arith.cmpi eq, %arg1, %c0_i32 : i32
    %1 = arith.extui %0 : i1 to i32
    %c0_i32_0 = arith.constant 0 : i32
    %2 = arith.cmpi ne, %1, %c0_i32_0 : i32
    scf.if %2 {
      %cst_19 = arith.constant 0.000000e+00 : f32
      %52 = vector.broadcast %cst_19 : f32 to vector<8x128xf32>
      %c0_20 = arith.constant 0 : index
      %c0_21 = arith.constant 0 : index
      %53 = vector.load %arg3[%c0_20, %c0_21] : memref<8x128xf32, #tpu.memory_space<vmem>>, vector<8x128xf32>
      tpu.vector_store %arg3[%c0_20, %c0_21], %52 {strides = array<i32>} : memref<8x128xf32, #tpu.memory_space<vmem>>, vector<8x128xf32>,
    } else {
    }
    %cst = arith.constant 0.000000e+00 : f32
    %3 = vector.broadcast %cst : f32 to vector<8x128xf32>
    %c0_i32_1 = arith.constant 0 : i32
    %c16_i32 = arith.constant 16 : i32
    %4 = arith.muli %c0_i32_1, %c16_i32 : i32
    %5 = tpu.assume_multiple %4, 16 : i32
    %6 = tpu.assume_multiple %5, 8 : i32
    %7 = arith.index_cast %6 : i32 to index
    %c0 = arith.constant 0 : index
    %8 = vector.load %arg2[%7, %c0] : memref<64x128xf32, #tpu.memory_space<vmem>>, vector<8x128xf32>
    %9 = arith.addf %3, %8 : vector<8x128xf32>
    %c8_i32 = arith.constant 8 : i32
    %10 = arith.addi %5, %c8_i32 : i32
    %11 = tpu.assume_multiple %10, 8 : i32
    %12 = arith.index_cast %11 : i32 to index
    %c0_2 = arith.constant 0 : index
    %13 = vector.load %arg2[%12, %c0_2] : memref<64x128xf32, #tpu.memory_space<vmem>>, vector<8x128xf32>
    %14 = arith.addf %3, %13 : vector<8x128xf32>
    %c1_i32 = arith.constant 1 : i32
    %c16_i32_3 = arith.constant 16 : i32
    %15 = arith.muli %c1_i32, %c16_i32_3 : i32
    %16 = tpu.assume_multiple %15, 16 : i32
    %17 = tpu.assume_multiple %16, 8 : i32
    %18 = arith.index_cast %17 : i32 to index
    %c0_4 = arith.constant 0 : index
    %19 = vector.load %arg2[%18, %c0_4] : memref<64x128xf32, #tpu.memory_space<vmem>>, vector<8x128xf32>
    %20 = arith.addf %9, %19 : vector<8x128xf32>
    %c8_i32_5 = arith.constant 8 : i32
    %21 = arith.addi %16, %c8_i32_5 : i32
    %22 = tpu.assume_multiple %21, 8 : i32
    %23 = arith.index_cast %22 : i32 to index
    %c0_6 = arith.constant 0 : index
    %24 = vector.load %arg2[%23, %c0_6] : memref<64x128xf32, #tpu.memory_space<vmem>>, vector<8x128xf32>
    %25 = arith.addf %14, %24 : vector<8x128xf32>
    %c2_i32 = arith.constant 2 : i32
    %c16_i32_7 = arith.constant 16 : i32
    %26 = arith.muli %c2_i32, %c16_i32_7 : i32
    %27 = tpu.assume_multiple %26, 16 : i32
    %28 = tpu.assume_multiple %27, 8 : i32
    %29 = arith.index_cast %28 : i32 to index
    %c0_8 = arith.constant 0 : index
    %30 = vector.load %arg2[%29, %c0_8] : memref<64x128xf32, #tpu.memory_space<vmem>>, vector<8x128xf32>
    %31 = arith.addf %20, %30 : vector<8x128xf32>
    %c8_i32_9 = arith.constant 8 : i32
    %32 = arith.addi %27, %c8_i32_9 : i32
    %33 = tpu.assume_multiple %32, 8 : i32
    %34 = arith.index_cast %33 : i32 to index
    %c0_10 = arith.constant 0 : index
    %35 = vector.load %arg2[%34, %c0_10] : memref<64x128xf32, #tpu.memory_space<vmem>>, vector<8x128xf32>
    %36 = arith.addf %25, %35 : vector<8x128xf32>
    %c3_i32 = arith.constant 3 : i32
    %c16_i32_11 = arith.constant 16 : i32
    %37 = arith.muli %c3_i32, %c16_i32_11 : i32
    %38 = tpu.assume_multiple %37, 16 : i32
    %39 = tpu.assume_multiple %38, 8 : i32
    %40 = arith.index_cast %39 : i32 to index
    %c0_12 = arith.constant 0 : index
    %41 = vector.load %arg2[%40, %c0_12] : memref<64x128xf32, #tpu.memory_space<vmem>>, vector<8x128xf32>
    %42 = arith.addf %31, %41 : vector<8x128xf32>
    %c8_i32_13 = arith.constant 8 : i32
    %43 = arith.addi %38, %c8_i32_13 : i32
    %44 = tpu.assume_multiple %43, 8 : i32
    %45 = arith.index_cast %44 : i32 to index
    %c0_14 = arith.constant 0 : index
    %46 = vector.load %arg2[%45, %c0_14] : memref<64x128xf32, #tpu.memory_space<vmem>>, vector<8x128xf32>
    %47 = arith.addf %36, %46 : vector<8x128xf32>
    %c4_i32 = arith.constant 4 : i32
    %c0_15 = arith.constant 0 : index
    %c0_16 = arith.constant 0 : index
    %48 = vector.load %arg3[%c0_15, %c0_16] : memref<8x128xf32, #tpu.memory_space<vmem>>, vector<8x128xf32>
    %49 = arith.addf %42, %47 : vector<8x128xf32>
    %50 = arith.addf %48, %49 : vector<8x128xf32>
    %c0_17 = arith.constant 0 : index
    %c0_18 = arith.constant 0 : index
    %51 = vector.load %arg3[%c0_17, %c0_18] : memref<8x128xf32, #tpu.memory_space<vmem>>, vector<8x128xf32>
    tpu.vector_store %arg3[%c0_17, %c0_18], %50 {strides = array<i32>} : memref<8x128xf32, #tpu.memory_space<vmem>>, vector<8x128xf32>,
    return
  }
  func.func @transform_0(%arg0: i32, %arg1: i32) -> (i32, i32) {
    %c1_i32 = arith.constant 1 : i32
    %0 = arith.muli %arg0, %c1_i32 : i32
    %1 = arith.addi %0, %arg1 : i32
    %c0_i32 = arith.constant 0 : i32
    %2 = arith.minsi %1, %c0_i32 : i32
    %c0_i32_0 = arith.constant 0 : i32
    %c0_i32_1 = arith.constant 0 : i32
    return %2, %c0_i32_0 : i32, i32
  }
  func.func @transform_1(%arg0: i32, %arg1: i32) -> (i32, i32) {
    %c0_i32 = arith.constant 0 : i32
    %c0_i32_0 = arith.constant 0 : i32
    return %arg0, %c0_i32 : i32, i32
  }
}

</mosaic_0001>

<bundles_post_ra>
// kernel: tpu_custom_call.1
= control target key start
LH: loop header
LB: loop body
LE: loop exit
PB: predicated region body
PF: predicated region fallthrough
CT: control target
= control target key end

     0   :  { %6 = vsyncpa [#allocation3], 0  ;;  %s181_s0 = inlined_call_operand.hbm [shape: f32[64,128], index: 0, kind: input, shape index: {}]   ;;  %s182_s1 = inlined_call_operand.hbm [shape: f32[8,128], index: 1, kind: output, shape index: {}]  }
   0x1   :  { %7 = vsyncpa [#allocation4], 0  ;;  %s143_s6 = smov [#allocation2]   ;;  %s95_s10 = scalar_lea.hbm %s181_s0, 1024 }
   0x2   :  { %s19_s7 = sshll.u32 %s143_s6, 4  ;;  %p96_p0 = scmp.ne.s32.totalorder %s181_s0, %s95_s10  ;;  %s20_s7 = int_to_ptr.vmem [resolvable:$true] %s19_s7 }
   0x3   :  { %p99_p1 = scmp.lt.u32.totalorder %s95_s10, %s181_s0 }
   0x5   :  { %p101_p2 = pnand %p99_p1, %p96_p0 }
   0x7   :  { %104 = shalt.err (!%p101_p2)
}
   0x8   :  { %s105_s15 = scalar_lea.vmem %s20_s7, 1024  ;;  %p110_p4 = scmp.lt.s32.totalorder %s20_s7, %s20_s7 }
   0x9   :  { %p106_p3 = scmp.ne.s32.totalorder %s20_s7, %s105_s15  ;;  %p111_p5 = scmp.lt.s32.totalorder %s105_s15, %s105_s15 }
   0xb   :  { %p112_p6 = por %p111_p5, %p110_p4 }
   0xd   :  { %p113_p7 = pnand %p112_p6, %p106_p3 }
   0xf   :  { %116 = shalt.err (!%p113_p7)
}
  0x10   :  { %s144_s16 = smov 128   ;;  %s145_s17 = smov 8  }
  0x11   :  { %25 = dma.hbm_to_vmem [thread:$0]  %s181_s0, 1024, %s20_s7, [#allocation3], %s144_s16, %s144_s16, %s145_s17  }
  0x12   :  { %139 = dma.done.wait [#allocation3], 1024  }
  0x13   :  { %140 = vsyncadd [#allocation3], 4294966272  ;;  %v38_v0 = vld [vmem:[#allocation2] sm:$0xff]  ;;  %v42_v1 = vld [vmem:[#allocation2 + $0x8] sm:$0xff]  ;;  %s146_s20 = smov [#allocation5]  }
  0x14   :  { %v45_v2 = vld [vmem:[#allocation2 + $0x10] sm:$0xff]  ;;  %v49_v4 = vld [vmem:[#allocation2 + $0x18] sm:$0xff]  ;;  %v52_v5 = vld [vmem:[#allocation2 + $0x20] sm:$0xff]  ;;  %s75_s21 = sshll.u32 %s146_s20, 4  ;;  %s76_s21 = int_to_ptr.vmem [resolvable:$true] %s75_s21 }
  0x15   :  { %v46_v3 = vadd.f32 %v45_v2, %v38_v0  ;;  %v56_v6 = vld [vmem:[#allocation2 + $0x28] sm:$0xff]  ;;  %v50_v7 = vadd.f32 %v49_v4, %v42_v1  ;;  %v59_v8 = vld [vmem:[#allocation2 + $0x30] sm:$0xff]  ;;  %v63_v10 = vld [vmem:[#allocation2 + $0x38] sm:$0xff]  ;;  %s117_s0 = scalar_lea.vmem %s76_s21, 128  ;;  %p122_p9 = scmp.lt.s32.totalorder %s76_s21, %s76_s21 }
  0x16   :  { %p118_p8 = scmp.ne.s32.totalorder %s76_s21, %s117_s0  ;;  %p123_p10 = scmp.lt.s32.totalorder %s117_s0, %s117_s0 }
  0x17   :  { %v53_v9 = vadd.f32 %v52_v5, %v46_v3  ;;  %v57_v11 = vadd.f32 %v56_v6, %v50_v7 }
  0x18   :  { %p124_p11 = por %p123_p10, %p122_p9 }
  0x19   :  { %v60_v12 = vadd.f32 %v59_v8, %v53_v9  ;;  %v64_v13 = vadd.f32 %v63_v10, %v57_v11 }
  0x1a   :  { %p125_p12 = pnand %p124_p11, %p118_p8 }
  0x1b   :  { %v66_v14 = vadd.f32 %v64_v13, %v60_v12 }
  0x1d   :  { %68 = vst [vmem:[#allocation5] sm:$0xff] %v66_v14 }
  0x1e   :  { %128 = shalt.err (!%p125_p12)
}
  0x1f   :  { %s129_s24 = scalar_lea.hbm %s182_s1, 128 }
  0x20   :  { %p130_p13 = scmp.ne.s32.totalorder %s182_s1, %s129_s24  ;;  %p133_p0 = scmp.lt.u32.totalorder %s129_s24, %s182_s1 }
  0x22   :  { %p135_p1 = pnand %p133_p0, %p130_p13 }
  0x24   :  { %138 = shalt.err (!%p135_p1)
}
  0x25   :  { %78 = dma.vmem_to_hbm [thread:$0]  %s76_s21, 128, %s182_s1, [#allocation4]  }
  0x26   :  { %141 = dma.done.wait [#allocation4], 128  }
  0x27   :  { %142 = vsyncadd [#allocation4], 4294967168 }
  0x28   :  { %82 = vsyncpa [#allocation3], 1 }
  0x29   :  { %83 = vsyncpa [#allocation4], 1 }

</bundles_post_ra>
